<compile_context>
chip_gen: v6e
topology: v6e:2x2x1
jax: 0.10.0
libtpu: 0.0.40
codegen_flags: <defaults>
</compile_context>

<pallas_src>
import jax
import jax.numpy as jnp
from jax.experimental import pallas as pl
from jax.experimental.pallas import tpu as pltpu


def _round_up(x, m):
    return ((x + m - 1) // m) * m


def _resident_spec(shape):
    """BlockSpec for an operand that stays resident across all grid steps."""
    # Constant index_map => never re-fetched; Buffered(1) avoids a redundant
    # second VMEM copy from default double-buffering.
    try:
        return pl.BlockSpec(shape, lambda i: (0, 0), pipeline_mode=pl.Buffered(1))
    except (TypeError, AttributeError):  # older API without pipeline_mode
        return pl.BlockSpec(shape, lambda i: (0, 0))


def content_tower_kernel(cf_ref, meta_ref, w_cf_ref, w_meta_ref, b_ref, o_ref):
    """One batch tile: o = relu(cf @ w_cf + meta @ w_meta + b).

    cf_ref:     (TB, p*cf_dim)    bf16 activations (p logical rows per lane-row)
    meta_ref:   (TB, p*meta_dim)  bf16 activations
    w_cf_ref:   (p*cf_dim, p*H)   bf16 BN-folded (block-diagonal) weights
    w_meta_ref: (p*meta_dim, p*H) bf16 BN-folded (block-diagonal) weights
    b_ref:      (1, p*H)          f32 BN-folded bias (tiled p times)
    o_ref:      (TB, p*H)         f32 output (lane-dense: p*H is a multiple of 128)
    """
    # Two MXU pushes (one per input) so torch.cat([cf, meta], 1) never has to be
    # materialized in HBM.  Both K dims pad to a single 128-deep MXU pass, so the
    # extra push + one (TB, p*H) VPU add is negligible in this memory-bound regime.
    y = jnp.dot(cf_ref[...], w_cf_ref[...], preferred_element_type=jnp.float32)
    y = y + jnp.dot(meta_ref[...], w_meta_ref[...],
                    preferred_element_type=jnp.float32)
    y = y + b_ref[...]
    # ReLU; Dropout(0.3) is identity in eval mode.
    o_ref[...] = jnp.maximum(y, 0.0).astype(o_ref.dtype)


def content_tower_forward(meta, cf, params, *, max_rows_per_step=8192):
    """meta: (B, meta_dim), cf: (B, cf_dim) -> (B, hidden_dim). Eval-mode forward."""
    B, cf_dim = cf.shape
    meta_dim = meta.shape[1]
    D = cf_dim + meta_dim
    H = params["w"].shape[1]
    eps = 1e-5

    # ---- Fold BatchNorm (eval) into the Linear weight/bias, in f32. ----
    scale = params["gamma"].astype(jnp.float32) * jax.lax.rsqrt(
        params["running_var"].astype(jnp.float32) + eps)                    # (1, H)
    w_fused = params["w"].astype(jnp.float32) * scale                       # (D, H)
    b_fused = ((params["b"].astype(jnp.float32)
                - params["running_mean"].astype(jnp.float32)) * scale
               + params["beta"].astype(jnp.float32))                        # (1, H)

    # torch.cat([cf, meta], dim=1) => weight rows [0, cf_dim) multiply cf.
    w_cf = w_fused[:cf_dim]                                                 # (cf_dim, H)
    w_meta = w_fused[cf_dim:]                                               # (meta_dim, H)

    # ---- Lane-dense packing factor p: output last dim becomes p*H (>=128). ----
    if H % 128 == 0:
        p = 1
    elif 128 % H == 0 and B % (128 // H) == 0:
        p = 128 // H
    else:
        p = 1  # TODO(synk): pad B / H here to enable lane-dense packing too.

    if p > 1:
        eye = jnp.eye(p, dtype=jnp.float32)
        w_cf = jnp.kron(eye, w_cf)          # (p*cf_dim, p*H) block-diagonal
        w_meta = jnp.kron(eye, w_meta)      # (p*meta_dim, p*H) block-diagonal
        b_fused = jnp.tile(b_fused, (1, p))  # (1, p*H)

    # bf16 MXU operands (fold done in f32 above to preserve accuracy).
    w_cf = w_cf.astype(jnp.bfloat16)
    w_meta = w_meta.astype(jnp.bfloat16)
    Bp = B // p
    cf_p = cf.astype(jnp.bfloat16).reshape(Bp, p * cf_dim)
    meta_p = meta.astype(jnp.bfloat16).reshape(Bp, p * meta_dim)

    # ---- Per-generation VMEM budget -> batch tile size. ----
    try:
        vmem_cap = int(pltpu.get_tpu_info().vmem_capacity_bytes)
    except Exception:
        vmem_cap = 64 * 1024 * 1024          # conservative (v7x per-core VMEM)
    vmem_limit = min(vmem_cap // 2, 64 * 1024 * 1024)
    tile_budget = int(vmem_limit * 0.75)     # headroom for compiler scratch

    act_bytes, out_bytes = 2, 4              # bf16 in, f32 out
    resident = ((p * cf_dim + p * meta_dim) * (p * H)) * act_bytes + (p * H) * 4
    # Activation and output tiles are double-buffered by the pipeline.
    row_bytes = 2 * p * (cf_dim * act_bytes + meta_dim * act_bytes + H * out_bytes)

    tbp_vmem = max(8, ((tile_budget - resident) // max(row_bytes, 1)) // 8 * 8)
    tbp_target = max(8, (max_rows_per_step // p) // 8 * 8)  # amortize per-step cost
    tbp_split = max(8, _round_up(pl.cdiv(Bp, 2), 8))        # >=2 blocks for v7x megacore
    TBp = min(tbp_vmem, tbp_target, tbp_split)
    if TBp >= Bp:
        TBp = Bp                                            # tiny batch: one block
    grid = (pl.cdiv(Bp, TBp),)

    cost = pl.CostEstimate(
        flops=2 * B * D * H,
        transcendentals=0,
        bytes_accessed=(B * D * act_bytes                       # bf16 activations
                        + (p * D) * (p * H) * act_bytes         # bf16 folded weights
                        + (p * H) * 4                           # f32 bias
                        + B * H * out_bytes),                   # f32 output
    )

    out_p = pl.pallas_call(
        content_tower_kernel,
        out_shape=jax.ShapeDtypeStruct((Bp, p * H), jnp.float32),
        grid=grid,
        in_specs=[
            pl.BlockSpec((TBp, p * cf_dim), lambda i: (i, 0)),    # cf tile (dbl-buf)
            pl.BlockSpec((TBp, p * meta_dim), lambda i: (i, 0)),  # meta tile (dbl-buf)
            _resident_spec((p * cf_dim, p * H)),                  # w_cf (resident)
            _resident_spec((p * meta_dim, p * H)),                # w_meta (resident)
            _resident_spec((1, p * H)),                           # fused bias (resident)
        ],
        out_specs=pl.BlockSpec((TBp, p * H), lambda i: (i, 0)),
        compiler_params=pltpu.CompilerParams(
            dimension_semantics=("parallel",),
            vmem_limit_bytes=int(vmem_limit),
        ),
        cost_estimate=cost,
    )(cf_p, meta_p, w_cf, w_meta, b_fused)

    # Row-major unpack back to (B, H); free at the byte level.
    return out_p.reshape(B, H)


def init_params(key, meta_dim, cf_dim, hidden_dim):
    """Deterministic synthetic parameters matching ContentTower.__init__ shapes."""
    in_dim = meta_dim + cf_dim
    k_w, k_b = jax.random.split(key)
    bound = 1.0 / jnp.sqrt(in_dim)
    # nn.Linear(in_dim, hidden_dim): weight (hidden, in), stored transposed (in, hidden)
    w = jax.random.uniform(k_w, (in_dim, hidden_dim), jnp.float32, -bound, bound)
    b = jax.random.uniform(k_b, (1, hidden_dim), jnp.float32, -bound, bound)
    # nn.BatchNorm1d(hidden_dim): use non-trivial values so the BN fold is exercised.
    k_g, k_be, k_m, k_v = jax.random.split(jax.random.fold_in(key, 1), 4)
    gamma = 1.0 + 0.1 * jax.random.normal(k_g, (1, hidden_dim), jnp.float32)
    beta = 0.1 * jax.random.normal(k_be, (1, hidden_dim), jnp.float32)
    running_mean = 0.1 * jax.random.normal(k_m, (1, hidden_dim), jnp.float32)
    running_var = 1.0 + 0.1 * jax.random.uniform(k_v, (1, hidden_dim), jnp.float32)
    return {
        "w": w, "b": b,
        "gamma": gamma, "beta": beta,
        "running_mean": running_mean, "running_var": running_var,
    }


if __name__ == "__main__":
    meta_dim, cf_dim, hidden_dim = 6, 10, 32
    batch = 64  # divisible by 128 // hidden_dim = 4 -> lane-dense packed path, grid=(2,)

    key = jax.random.PRNGKey(0)
    k_params, k_meta, k_cf = jax.random.split(key, 3)

    params = init_params(k_params, meta_dim, cf_dim, hidden_dim)
    meta = jax.random.normal(k_meta, (batch, meta_dim), jnp.float32)
    cf = jax.random.normal(k_cf, (batch, cf_dim), jnp.float32)

    out = content_tower_forward(meta, cf, params)
    jax.block_until_ready(out)
    assert out.shape == (batch, hidden_dim)

    # Reference 1: exact eval-mode module semantics in f32 (tolerance sized for
    # the kernel's bf16 activations/weights).
    x_ref = jnp.concatenate([cf, meta], axis=1)
    y_ref = x_ref @ params["w"] + params["b"]
    y_ref = (y_ref - params["running_mean"]) / jnp.sqrt(params["running_var"] + 1e-5)
    y_ref = y_ref * params["gamma"] + params["beta"]
    y_f32 = jnp.maximum(y_ref, 0.0)
    assert jnp.allclose(out, y_f32, atol=2e-2, rtol=2e-2), \
        float(jnp.max(jnp.abs(out - y_f32)))

    # Reference 2: same bf16 quantization as the kernel -> tight tolerance
    # (isolates the packing / tiling / BN-fold logic from bf16 rounding).
    eps = 1e-5
    scale = params["gamma"] * jax.lax.rsqrt(params["running_var"] + eps)
    w_fused_q = (params["w"] * scale).astype(jnp.bfloat16)
    b_fused_q = (params["b"] - params["running_mean"]) * scale + params["beta"]
    y_q = jnp.dot(cf.astype(jnp.bfloat16), w_fused_q[:cf_dim],
                  preferred_element_type=jnp.float32)
    y_q = y_q + jnp.dot(meta.astype(jnp.bfloat16), w_fused_q[cf_dim:],
                        preferred_element_type=jnp.float32)
    y_q = jnp.maximum(y_q + b_fused_q, 0.0)
    assert jnp.allclose(out, y_q, atol=1e-3, rtol=1e-3), \
        float(jnp.max(jnp.abs(out - y_q)))

    print("KERNEL_OK")
</pallas_src>

<mosaic_0001>
module attributes {stable_mosaic.version = 11 : i64} {
  func.func @content_tower_kernel(%arg0: i32, %arg1: memref<8x40xbf16, #tpu.memory_space<vmem>>, %arg2: memref<8x24xbf16, #tpu.memory_space<vmem>>, %arg3: memref<40x128xbf16, #tpu.memory_space<vmem>>, %arg4: memref<24x128xbf16, #tpu.memory_space<vmem>>, %arg5: memref<1x128xf32, #tpu.memory_space<vmem>>, %arg6: memref<8x128xf32, #tpu.memory_space<vmem>>) attributes {dimension_semantics = [#tpu.dimension_semantics<parallel>], iteration_bounds = array<i64: 2>, scalar_prefetch = 0 : i64, scratch_operands = 0 : i64, tpu.core_type = #tpu.core_type<tc>, window_params = [{transform_indices = @transform_0, window_bounds = array<i64: 8, 40>}, {transform_indices = @transform_1, window_bounds = array<i64: 8, 24>}, {pipeline_mode = #tpu.pipeline_mode<synchronous>, transform_indices = @transform_2, window_bounds = array<i64: 40, 128>}, {pipeline_mode = #tpu.pipeline_mode<synchronous>, transform_indices = @transform_3, window_bounds = array<i64: 24, 128>}, {pipeline_mode = #tpu.pipeline_mode<synchronous>, transform_indices = @transform_4, window_bounds = array<i64: 1, 128>}, {transform_indices = @transform_5, window_bounds = array<i64: 8, 128>}]} {
    %c0 = arith.constant 0 : index
    %c0_0 = arith.constant 0 : index
    %0 = vector.load %arg1[%c0, %c0_0] : memref<8x40xbf16, #tpu.memory_space<vmem>>, vector<8x40xbf16>
    %c0_1 = arith.constant 0 : index
    %c0_2 = arith.constant 0 : index
    %1 = vector.load %arg3[%c0_1, %c0_2] : memref<40x128xbf16, #tpu.memory_space<vmem>>, vector<40x128xbf16>
    %cst = arith.constant dense<0.000000e+00> : vector<8x128xf32>
    %2 = tpu.matmul %0, %1, %cst {dimension_numbers = #tpu.dot_dimension_numbers<[1], [0], [0], [1], [0, 0, 1, 1], [], []>} : vector<8x40xbf16>, vector<40x128xbf16>, vector<8x128xf32> -> vector<8x128xf32>
    %c0_3 = arith.constant 0 : index
    %c0_4 = arith.constant 0 : index
    %3 = vector.load %arg2[%c0_3, %c0_4] : memref<8x24xbf16, #tpu.memory_space<vmem>>, vector<8x24xbf16>
    %c0_5 = arith.constant 0 : index
    %c0_6 = arith.constant 0 : index
    %4 = vector.load %arg4[%c0_5, %c0_6] : memref<24x128xbf16, #tpu.memory_space<vmem>>, vector<24x128xbf16>
    %cst_7 = arith.constant dense<0.000000e+00> : vector<8x128xf32>
    %5 = tpu.matmul %3, %4, %cst_7 {dimension_numbers = #tpu.dot_dimension_numbers<[1], [0], [0], [1], [0, 0, 1, 1], [], []>} : vector<8x24xbf16>, vector<24x128xbf16>, vector<8x128xf32> -> vector<8x128xf32>
    %6 = arith.addf %2, %5 : vector<8x128xf32>
    %c0_8 = arith.constant 0 : index
    %c0_9 = arith.constant 0 : index
    %7 = vector.load %arg5[%c0_8, %c0_9] : memref<1x128xf32, #tpu.memory_space<vmem>>, vector<1x128xf32>
    %8 = vector.broadcast %7 : vector<1x128xf32> to vector<8x128xf32>
    %9 = arith.addf %6, %8 : vector<8x128xf32>
    %cst_10 = arith.constant 0.000000e+00 : f32
    %10 = vector.broadcast %cst_10 : f32 to vector<8x128xf32>
    %11 = arith.maximumf %9, %10 : vector<8x128xf32>
    %c0_11 = arith.constant 0 : index
    %c0_12 = arith.constant 0 : index
    %12 = vector.load %arg6[%c0_11, %c0_12] : memref<8x128xf32, #tpu.memory_space<vmem>>, vector<8x128xf32>
    tpu.vector_store %arg6[%c0_11, %c0_12], %11 {strides = array<i32>} : memref<8x128xf32, #tpu.memory_space<vmem>>, vector<8x128xf32>,
    return
  }
  func.func @transform_0(%arg0: i32) -> (i32, i32) {
    %c0_i32 = arith.constant 0 : i32
    %c0_i32_0 = arith.constant 0 : i32
    return %arg0, %c0_i32 : i32, i32
  }
  func.func @transform_1(%arg0: i32) -> (i32, i32) {
    %c0_i32 = arith.constant 0 : i32
    %c0_i32_0 = arith.constant 0 : i32
    return %arg0, %c0_i32 : i32, i32
  }
  func.func @transform_2(%arg0: i32) -> (i32, i32) {
    %c0_i32 = arith.constant 0 : i32
    %c0_i32_0 = arith.constant 0 : i32
    %c0_i32_1 = arith.constant 0 : i32
    return %c0_i32, %c0_i32_0 : i32, i32
  }
  func.func @transform_3(%arg0: i32) -> (i32, i32) {
    %c0_i32 = arith.constant 0 : i32
    %c0_i32_0 = arith.constant 0 : i32
    %c0_i32_1 = arith.constant 0 : i32
    return %c0_i32, %c0_i32_0 : i32, i32
  }
  func.func @transform_4(%arg0: i32) -> (i32, i32) {
    %c0_i32 = arith.constant 0 : i32
    %c0_i32_0 = arith.constant 0 : i32
    %c0_i32_1 = arith.constant 0 : i32
    return %c0_i32, %c0_i32_0 : i32, i32
  }
  func.func @transform_5(%arg0: i32) -> (i32, i32) {
    %c0_i32 = arith.constant 0 : i32
    %c0_i32_0 = arith.constant 0 : i32
    return %arg0, %c0_i32 : i32, i32
  }
}

</mosaic_0001>

<bundles_post_ra>
// kernel: tpu_custom_call.1
= control target key start
LH: loop header
LB: loop body
LE: loop exit
PB: predicated region body
PF: predicated region fallthrough
CT: control target
= control target key end

     0   :  { %s1159_s0 = inlined_call_operand.hbm [shape: bf16[16,40], index: 0, kind: input, shape index: {}]   ;;  %s1160_s1 = inlined_call_operand.hbm [shape: bf16[16,24], index: 1, kind: input, shape index: {}]   ;;  %s1161_s2 = inlined_call_operand.hbm [shape: bf16[40,128], index: 2, kind: input, shape index: {}]   ;;  %s1162_s3 = inlined_call_operand.hbm [shape: bf16[24,128], index: 3, kind: input, shape index: {}]   ;;  %s1163_s4 = inlined_call_operand.vmem [shape: f32[1,128], index: 4, kind: input, shape index: {}]   ;;  %s1164_s5 = inlined_call_operand.hbm [shape: f32[16,128], index: 5, kind: output, shape index: {}]  }
   0x1   :  { %1169 = sst [smem:[#allocation16_spill]] %s1161_s2 }
   0x2   :  { %1170 = sst [smem:[#allocation17_spill]] %s1162_s3 }
   0x3   :  { %10 = vsyncpa [#allocation3], 0 }
   0x4   :  { %12 = vsyncpa [#allocation3 + $0x1], 0 }
   0x5   :  { %13 = vsyncpa [#allocation6], 0 }
   0x6   :  { %15 = vsyncpa [#allocation6 + $0x1], 0 }
   0x7   :  { %16 = vsyncpa [#allocation9], 0 }
   0x8   :  { %17 = vsyncpa [#allocation4], 0 }
   0x9   :  { %19 = vsyncpa [#allocation4 + $0x1], 0  ;;  %s930_s18 = smov 0   ;;  %s932_s19 = smov 0  }
   0xa   :  { %s934_s20 = smov 0   ;;  %s936_s21 = smov 0  }
   0xb LB: > { %s951_s22 = sadd.s32 4294967295, %s889_s21   ;;  %s572_s23 = sadd.s32 4294967294, %s889_s21   ;;  %s889_s21 = sphi %s936_s21, %s1192_s21   ;;  %s885_s20 = sphi %s934_s20, %s1191_s20   ;;  %s881_s19 = sphi %s932_s19, %s1190_s19   ;;  %s877_s18 = sphi %s930_s18, %s1189_s18  }
   0xc   : > { %p45_p0 = scmp.ne.s32.totalorder %s881_s19, %s877_s18  ;;  %p1165_p1 = scmp.eq.s32.totalorder %s951_s22, 0 }
   0xd   : > { %p164_p3 = scmp.eq.s32.totalorder %s572_s23, 1  ;;  %p573_p5 = scmp.ge.s32.totalorder %s889_s21, 1 }
   0xe   : > { %p960_p4 = por %p1165_p1, %p45_p0  ;;  %p171_p7 = scmp.lt.s32.totalorder %s889_s21, 3 }
   0xf   : > { %p965_p6 = por %p164_p3, %p45_p0  ;;  %s891_s27 = smov [#allocation7]  }
  0x10   : > { %s1171_s24 = scalar_select %p960_p4, 1, 0 }
  0x11   : > { %s1172_s25 = scalar_select %p965_p6, 1, 0 }
  0x12   : > { %p970_p8 = pnand %p573_p5, %p171_p7  ;;  %s183_s28 = sshll.u32 %s891_s27, 4  ;;  %s184_s28 = int_to_ptr.vmem [resolvable:$true] %s183_s28 }
  0x13   : > { %s892_s30 = smov [#allocation8]   ;;  %s716_s7 = scalar_lea.vmem %s184_s28, 320 }
  0x14   : > { %s1173_s26 = scalar_select %p970_p8, 1, 0 }
  0x15   : > { %p638_p9 = pneg %p970_p8  ;;  %s196_s6 = sshll.u32 %s892_s30, 4  ;;  %s197_s6 = int_to_ptr.vmem [resolvable:$true] %s196_s6 }
  0x16   : > { %p717_p13 = scmp.ne.s32.totalorder %s184_s28, %s716_s7  ;;  %p724_p5 = scmp.lt.s32.totalorder %s184_s28, %s184_s28 }
  0x17   : > { %p979_p11 = pnand %p638_p9, %p1165_p1  ;;  %p725_p7 = scmp.lt.s32.totalorder %s716_s7, %s716_s7 }
  0x19   : > { %p707_p12 = pneg %p979_p11  ;;  %p726_p10 = por %p725_p7, %p724_p5 }
  0x1b   : > { %p719_p0 = pnand %p717_p13, %p707_p12 }
  0x1d   : > { %p720_p3 = pneg %p719_p0 }
  0x1f   : > { %p727_p9 = pnand %p726_p10, %p720_p3 }
  0x21   : > { %730 = shalt.err (!%p727_p9)
}
  0x22   : > { %s893_s8 = smov 64   ;;  %s894_s9 = smov 4  }
  0x23   : > { %s1175_s2 = sld [smem:[#allocation16_spill]]  ;;  %s742_s12 = scalar_lea.vmem %s197_s6, 192 }
  0x24   : > { %p743_p1 = scmp.ne.s32.totalorder %s197_s6, %s742_s12  ;;  %p750_p2 = scmp.lt.s32.totalorder %s197_s6, %s197_s6 }
  0x25   : > { %p751_p6 = scmp.lt.s32.totalorder %s742_s12, %s742_s12 }
  0x26   : > { %p745_p13 = pnand %p743_p1, %p707_p12 }
  0x27   : > { %p752_p5 = por %p751_p6, %p750_p2 }
  0x28   : > { %p746_p0 = pneg %p745_p13 }
  0x29   : > { %641 = dma.hbm_to_vmem [thread:$0]  (!%p979_p11), %s1175_s2, 320, %s184_s28, [#allocation6], %s893_s8, %s893_s8, %s894_s9  }
  0x2a   : > { %p753_p10 = pnand %p752_p5, %p746_p0 }
  0x2c   : > { %756 = shalt.err (!%p753_p10)
}
  0x2d   : > { %s1176_s3 = sld [smem:[#allocation17_spill]]  ;;  %s1002_s15 = sadd.s32 1, %s889_s21  }
  0x2e   : > { %s32_s16 = sadd.s32 1, %s885_s20  ;;  %s29_s17 = ssub.s32 %s889_s21, %s1002_s15 }
  0x2f   : > { %p39_p1 = scmp.ne.s32.totalorder %s885_s20, %s881_s19  ;;  %p30_p2 = scmp.eq.s32.totalorder %s29_s17, 0 }
  0x30   : > { %p40_p6 = scmp.eq.s32.totalorder %s889_s21, 0  ;;  %p1177_p12 = scmp.eq.s32.totalorder %s951_s22, 1 }
  0x31   : > { %p658_p7 = scmp.lt.s32.totalorder %s889_s21, 2  ;;  %s213_s28 = sand.u32 1, %s885_s20  }
  0x32   : > { %p1012_p3 = por %p1177_p12, %p39_p1  ;;  %p41_p9 = por %p40_p6, %p39_p1 }
  0x33   : > { %644 = dma.hbm_to_vmem [thread:$0]  (!%p979_p11), %s1176_s3, 192, %s197_s6, [#allocation9], %s893_s8, %s893_s8, %s894_s9  }
  0x34   : > { %s1178_s23 = scalar_select %p1012_p3, 1, 0 }
  0x35   : > { %s1018_s27 = scalar_select %p30_p2, %s885_s20, %s32_s16  }
  0x36   : > { %s1021_s29 = sshll.u32 %s213_s28, 2  ;;  %s578_s30 = sshll.u32 %s889_s21, 6 }
  0x37   : > { %s1027_s8 = scalar_lea.hbm %s1159_s0, %s578_s30  ;;  %s217_s9 = scalar_lea.vmem [#allocation2], %s1021_s29 }
  0x38   : > { %s224_s10 = sshll.u32 %s217_s9, 4  ;;  %p1032_p11 = pnand %p658_p7, %p41_p9  ;;  %s1030_s10 = int_to_ptr.vmem [resolvable:$true] %s224_s10 }
  0x39   : > { %s1039_s14 = scalar_lea.hbm %s1160_s1, %s578_s30  ;;  %s231_s16 = sand.u32 1, %s889_s21  }
  0x3a   : > { %s214_s17 = scalar_lea.sflag [#allocation3], %s213_s28  ;;  %s757_s6 = scalar_lea.hbm %s1027_s8, 64 }
  0x3b   : > { %p758_p13 = scmp.ne.s32.totalorder %s1027_s8, %s757_s6  ;;  %p759_p0 = pneg %p1032_p11 }
  0x3c   : > { %s762_s2 = scalar_lea.hbm %s1159_s0, 128  ;;  %p763_p1 = scmp.lt.s32.totalorder %s1027_s8, %s1159_s0 }
  0x3d   : > { %p760_p5 = pnand %p759_p0, %p758_p13  ;;  %p764_p2 = scmp.lt.s32.totalorder %s762_s2, %s757_s6 }
  0x3f   : > { %p761_p10 = pneg %p760_p5  ;;  %p765_p6 = por %p764_p2, %p763_p1 }
  0x41   : > { %p766_p12 = pnand %p765_p6, %p761_p10 }
  0x43   : > { %769 = shalt.err (!%p766_p12)
}
  0x44   : > { %s770_s28 = scalar_lea.vmem %s1030_s10, 64  ;;  %s895_s30 = smov [#allocation2]  }
  0x45   : > { %p771_p7 = scmp.ne.s32.totalorder %s1030_s10, %s770_s28  ;;  %s775_s13 = sshll.u32 %s895_s30, 4  ;;  %s776_s13 = int_to_ptr.vmem [resolvable:$false] %s775_s13 }
  0x46   : > { %s777_s7 = scalar_lea.vmem %s776_s13, 128  ;;  %p778_p5 = scmp.lt.s32.totalorder %s1030_s10, %s776_s13 }
  0x47   : > { %p773_p9 = pnand %p771_p7, %p759_p0  ;;  %p779_p3 = scmp.lt.s32.totalorder %s777_s7, %s770_s28 }
  0x49   : > { %p774_p13 = pneg %p773_p9  ;;  %p780_p4 = por %p779_p3, %p778_p5 }
  0x4b   : > { %p781_p1 = pnand %p780_p4, %p774_p13 }
  0x4d   : > { %784 = shalt.err (!%p781_p1)
}
  0x4e   : > { %648 = dma.hbm_to_vmem [thread:$0]  (!%p1032_p11), %s1027_s8, 64, %s1030_s10, %s214_s17  }
  0x4f   : > { %s235_s2 = scalar_lea.vmem [#allocation5], %s1021_s29  ;;  %s232_s6 = scalar_lea.sflag [#allocation6], %s231_s16 }
  0x50   : > { %s242_s3 = sshll.u32 %s235_s2, 4  ;;  %s785_s9 = scalar_lea.hbm %s1039_s14, 64  ;;  %s243_s3 = int_to_ptr.vmem [resolvable:$true] %s242_s3 }
  0x51   : > { %p786_p3 = scmp.ne.s32.totalorder %s1039_s14, %s785_s9  ;;  %s790_s30 = scalar_lea.hbm %s1160_s1, 128 }
  0x52   : > { %p791_p2 = scmp.lt.s32.totalorder %s1039_s14, %s1160_s1  ;;  %p792_p6 = scmp.lt.s32.totalorder %s790_s30, %s785_s9 }
  0x53   : > { %p788_p4 = pnand %p786_p3, %p759_p0 }
  0x54   : > { %p793_p12 = por %p792_p6, %p791_p2 }
  0x55   : > { %p789_p10 = pneg %p788_p4 }
  0x57   : > { %p794_p7 = pnand %p793_p12, %p789_p10 }
  0x59   : > { %797 = shalt.err (!%p794_p7)
}
  0x5a   : > { %s798_s29 = scalar_lea.vmem %s243_s3, 64  ;;  %s896_s8 = smov [#allocation5]  }
  0x5b   : > { %p799_p9 = scmp.ne.s32.totalorder %s243_s3, %s798_s29  ;;  %s803_s10 = sshll.u32 %s896_s8, 4  ;;  %s804_s10 = int_to_ptr.vmem [resolvable:$false] %s803_s10 }
  0x5c   : > { %s805_s16 = scalar_lea.vmem %s804_s10, 128  ;;  %p806_p1 = scmp.lt.s32.totalorder %s243_s3, %s804_s10 }
  0x5d   : > { %p801_p13 = pnand %p799_p9, %p759_p0  ;;  %p807_p3 = scmp.lt.s32.totalorder %s805_s16, %s798_s29 }
  0x5f   : > { %p802_p5 = pneg %p801_p13  ;;  %p808_p4 = por %p807_p3, %p806_p1 }
  0x61   : > { %p809_p8 = pnand %p808_p4, %p802_p5 }
  0x63   : > { %812 = shalt.err (!%p809_p8)
}
  0x64   : > { %651 = dma.hbm_to_vmem [thread:$0]  (!%p1032_p11), %s1039_s14, 64, %s243_s3, %s232_s6  }
  0x65   : > { %p1180_p10 = scmp.ne.s32.totalorder %s1173_s26, 0 }
  0x66   : > { %s1090_s17 = sand.u32 (!%p1180_p10), 1, %s881_s19   ;;  %p1181_p0 = scmp.ne.s32.totalorder (!%p1180_p10), %s1171_s24, 0 }
  0x67   : > { %251 = sbr.rel (%p1180_p10) target bundleno = 344 (0x158), region = 40  ;;  %s582_s2 = sshll.u32 (!%p1180_p10), %s1090_s17, 2 }
  0x68   : > { %s254_s9 = scalar_lea.sflag (!%p1180_p10), [#allocation3], %s1090_s17  ;;  %s1094_s12 = scalar_lea.vmem (!%p1180_p10), [#allocation2], %s582_s2 }
  0x6c   : > { %856 = dma.done.wait (%p1181_p0), %s254_s9, 64  }
  0x6d   : > { %858 = vsyncadd (%p1181_p0), %s254_s9, 4294967232  ;;  %s262_s11 = sand.u32 1, %s951_s22   ;;  %s266_s14 = scalar_lea.vmem [#allocation5], %s582_s2 }
  0x6e   : > { %s263_s26 = scalar_lea.sflag [#allocation6], %s262_s11 }
  0x6f   : > { %860 = dma.done.wait (%p1181_p0), %s263_s26, 64  }
  0x70   : > { %862 = vsyncadd (%p1181_p0), %s263_s26, 4294967232  ;;  %p1182_p8 = scmp.eq.s32.totalorder %s951_s22, 0 }
  0x72   : > { %864 = dma.done.wait (%p1182_p8), [#allocation6], 320   ;;  %p1183_p11 = pmov %p1182_p8 }
  0x73   : > { %p1184_p2 = pmov %p1182_p8 }
  0x74   : > { %866 = vsyncadd (%p1183_p11), [#allocation6], 4294966976 }
  0x75   : > { %868 = dma.done.wait (%p1184_p2), [#allocation9], 192   ;;  %p1185_p6 = pmov %p1184_p2 }
  0x76   : > { %v897_v0 = vmov 0.0   ;;  %vm898_vm0 = vmmov 0   ;;  %vm330_vm1 = vcmask 1043456   ;;  %v700_v1 = vld [vmem:[#allocation8 + $0x8] ss:$0 sps:$4 sm:$0xff]   ;;  %v702_v5 = vld [vmem:[#allocation8] sm:$0xff]  }
  0x77   : > { %870 = vsyncadd (%p1185_p6), [#allocation9], 4294967104  ;;  %606 = vmatprep.subr.bf16.mxu0 %v897_v0  ;;  %614 = vmatprep.subr.bf16.mxu1 %v897_v0  ;;  %v701_v2 = vld [vmem:[#allocation7 + $0x10] ss:$0 sps:$4 sm:$0xff]   ;;  %v332_v3 = vsel %vm330_vm1, %v700_v1, 0  ;;  %v703_v6 = vld [vmem:[#allocation7 + $0x8] sm:$0xff]  }
  0x78   : > { %610 = vmatprep.mubr.msk.bf16.mxu0 %vm898_vm0, %v897_v0  ;;  %620 = vmatprep.mubr.msk.bf16.mxu1 %vm898_vm0, %v897_v0  ;;  %v394_v4 = vsel %vm330_vm1, %v701_v2, 0  ;;  %v313_v7 = vld [vmem:[%s266_s14] sm:$0xf]  ;;  %vm326_vm2 = vcmask 195584   ;;  %v704_v8 = vld [vmem:[#allocation7] sm:$0xff]   ;;  %vm389_vm3 = vcmask 326656  }
  0x79   : > { %607 = vmatpush3.bf16.msra.mxu0 %v332_v3  ;;  %615 = vmatpush3.bf16.msra.mxu1 %v394_v4  ;;  %v307_v9 = vld [vmem:[%s1094_s12] sm:$0xf]  ;;  %s586_s24 = sshll.u32 %s1090_s17, 3  ;;  %s596_s28 = sshll.u32 %s951_s22, 7 }
  0x7a   : > { %608 = vmatprep.subr.bf16.mxu0 %v897_v0  ;;  %616 = vmatprep.subr.bf16.mxu1 %v897_v0  ;;  %v594_v14 = vld [vmem:[%s1163_s4] ss:$0 sm:$0xff]  ;;  %s305_s30 = scalar_lea.vmem [#allocation10], %s586_s24  ;;  %s1122_s8 = scalar_lea.hbm %s1164_s5, %s596_s28 }
  0x7b   : > { %s460_s13 = sshll.u32 %s305_s30, 4  ;;  %s447_s10 = scalar_lea.sflag [#allocation4], %s1090_s17  ;;  %s461_s13 = int_to_ptr.vmem [resolvable:$true] %s460_s13 }
  0x7c   : > { %s813_s16 = scalar_lea.vmem %s461_s13, 128  ;;  %p1186_p7 = scmp.ne.s32.totalorder %s1178_s23, 0 }
  0x7d   : > { %609 = vmatpush3.bf16.msra.mxu0 %v702_v5  ;;  %617 = vmatpush3.bf16.msra.mxu1 %v703_v6  ;;  %p814_p12 = scmp.ne.s32.totalorder %s461_s13, %s813_s16  ;;  %s899_s22 = smov [#allocation10]  }
  0x7e   : > { %618 = vmatprep.subr.bf16.mxu1 %v897_v0  ;;  %s817_s2 = sshll.u32 %s899_s22, 4  ;;  %s818_s2 = int_to_ptr.vmem [resolvable:$false] %s817_s2 }
  0x7f   : > { %p815_p9 = pnand %p814_p12, %p1186_p7  ;;  %s819_s9 = scalar_lea.vmem %s818_s2, 256 }
  0x80   : > { %611 = vmatmul.mubr.msk.bf16.vlgmr.msra.gmra.mxu0 %vm326_vm2, %v313_v7  ;;  %p820_p5 = scmp.lt.s32.totalorder %s461_s13, %s818_s2  ;;  %p821_p1 = scmp.lt.s32.totalorder %s819_s9, %s813_s16 }
  0x81   : > { %619 = vmatpush3.bf16.msra.mxu1 %v704_v8  ;;  %p816_p13 = pneg %p815_p9 }
  0x82   : > { %p822_p3 = por %p821_p1, %p820_p5 }
  0x84   : > { %621 = vmatmul.mubr.msk.bf16.vlgmr.msra.gmra.mxu1 %vm389_vm3, %v307_v9  ;;  %p823_p4 = pnand %p822_p3, %p816_p13 }
 0x140   : > { %v368_v10 = vpop.f32.mrf.mxu0 }
 0x142   : > { %v612_v11 = vpop.f32.mrf.mxu0 }
 0x144   : > { %v371_v12 = vpop.f32.mrf.mxu0  ;;  %v430_v13 = vpop.f32.mrf.mxu1 }
 0x145   : > { %v431_v15 = vadd.f32 %v430_v13, %v368_v10 }
 0x146   : > { %v613_v16 = vpop.f32.mrf.mxu0  ;;  %v622_v17 = vpop.f32.mrf.mxu1 }
 0x147   : > { %v443_v18 = vadd.f32 %v594_v14, %v431_v15 }
 0x148   : > { %v433_v19 = vpop.f32.mrf.mxu1 }
 0x149   : > { %v444_v20 = vmax.f32 %v443_v18, 0.0 }
 0x14a   : > { %v623_v21 = vpop.f32.mrf.mxu1 }
 0x14b   : > { %445 = vst [vmem:[%s305_s30] sm:$0xff] %v444_v20 }
 0x14c   : > { %826 = shalt.err (!%p823_p4)
}
 0x14d   : > { %s827_s12 = scalar_lea.hbm %s1122_s8, 128  ;;  %s831_s26 = scalar_lea.hbm %s1164_s5, 256 }
 0x14e   : > { %p828_p10 = scmp.ne.s32.totalorder %s1122_s8, %s827_s12  ;;  %p832_p11 = scmp.lt.s32.totalorder %s1122_s8, %s1164_s5 }
 0x14f   : > { %p833_p2 = scmp.lt.s32.totalorder %s831_s26, %s827_s12 }
 0x150   : > { %p829_p0 = pnand %p828_p10, %p1186_p7 }
 0x151   : > { %p834_p6 = por %p833_p2, %p832_p11 }
 0x152   : > { %p830_p8 = pneg %p829_p0 }
 0x154   : > { %p835_p12 = pnand %p834_p6, %p830_p8 }
 0x156   : > { %838 = shalt.err (!%p835_p12)
}
 0x157   : > { %636 = dma.vmem_to_hbm [thread:$0]  (%p1186_p7), %s461_s13, 128, %s1122_s8, %s447_s10  }
 0x158 PF: > { %s472_s3 = sand.u32 1, %s877_s18   ;;  %p1187_p9 = scmp.ne.s32.totalorder %s1172_s25, 0 }
 0x159   : > { %p1188_p13 = scmp.ge.s32.totalorder %s889_s21, 2  ;;  %s473_s6 = scalar_lea.sflag [#allocation4], %s472_s3 }
 0x15b   : > { %p653_p5 = pnand %p1188_p13, %p1187_p9 }
 0x15d   : > { %p654_p1 = pneg %p653_p5 }
 0x15f   : > { %872 = dma.done.wait (%p654_p1), %s473_s6, 128  }
 0x160   : > { %874 = vsyncadd (%p654_p1), %s473_s6, 4294967168  ;;  %p22_p3 = scmp.ge.s32.totalorder %s1002_s15, 4   ;;  %s1189_s18 = smov %s881_s19 }
 0x161   : > { %s1190_s19 = smov %s885_s20  ;;  %s1191_s20 = smov %s1018_s27 }
 0x162   : > { %s1192_s21 = smov %s1002_s15  ;;  %24 = sbr.rel (!%p22_p3) target bundleno = 11 (0xb), region = 106 }
 0x167   :  { %478 = vsyncpa [#allocation3], 1 }
 0x168   :  { %480 = vsyncpa [#allocation3 + $0x1], 1 }
 0x169   :  { %481 = vsyncpa [#allocation6], 1 }
 0x16a   :  { %483 = vsyncpa [#allocation6 + $0x1], 1 }
 0x16b   :  { %484 = vsyncpa [#allocation9], 1 }
 0x16c   :  { %485 = vsyncpa [#allocation4], 1 }
 0x16d   :  { %487 = vsyncpa [#allocation4 + $0x1], 1 }

</bundles_post_ra>
